<compile_context>
chip_gen: v7x
topology: tpu7x:2x2x1
jax: 0.10.0
libtpu: 0.0.40
codegen_flags: <defaults>
</compile_context>

<pallas_src>
import jax
import jax.numpy as jnp
from jax import lax
from jax.experimental import pallas as pl
from jax.experimental.pallas import tpu as pltpu


_TARGET_TILE_BYTES = 12 << 20   # per x-tile buffer (pipeline double-buffers it)
_MIN_SPLIT_BYTES = 4 << 20      # past this, force >=2 batch tiles so v7x's 2 TCs both stream
_VMEM_LIMIT_BYTES = 48 << 20    # > every generation's scoped default, < v7x's 64 MiB physical


def _round_up(a: int, m: int) -> int:
    return ((a + m - 1) // m) * m


def _round_down(a: int, m: int) -> int:
    return (a // m) * m


def _cdiv(a: int, b: int) -> int:
    return (a + b - 1) // b


def _choose_tiles(batch: int, dim_in: int):
    """Pick (TB rows, TK features) per tile.

    VMEM accounting uses the padded layout: a (TB, TK) f32 block really occupies
    round_up(TB, 8) * round_up(TK, 128) * 4 bytes.  Target ~12 MiB per x buffer
    (24 MiB double-buffered), which amortizes the ~0.35 us/grid-step overhead
    (MiB-scale DMAs hit >=85% of HBM roofline) and fits under the 48 MiB explicit
    VMEM limit on v5e / v6e (128 MiB physical) and v7x (64 MiB physical).
    """
    d_pad = _round_up(dim_in, 128)
    row_bytes = d_pad * 4
    tb_min = min(_round_up(batch, 8), 128)

    if tb_min * row_bytes <= _TARGET_TILE_BYTES:
        # Full feature dim fits in one chunk: tile over batch only (nk == 1).
        tk = dim_in
        tb = max(tb_min, _round_down(_TARGET_TILE_BYTES // row_bytes, 128))
        if tb >= batch:
            if batch >= 256 and batch * row_bytes > _MIN_SPLIT_BYTES:
                # Large single-tile batch: split into >=2 tiles so the "parallel"
                # grid axis actually spans both TensorCores on v7x.
                tb = _round_up(_cdiv(batch, 2), 128)
            else:
                tb = _round_up(batch, 8)   # one small tile covers the whole batch
        return tb, tk

    # Large feature dim: also tile over D, accumulate partial dots in VMEM scratch.
    tb = _round_up(min(batch, 512), 8)
    tk = max(128, _round_down(_TARGET_TILE_BYTES // (_round_up(tb, 8) * 4), 128))
    tk = min(tk, d_pad)
    if tk >= dim_in:
        tk = dim_in
    return tb, tk


def _make_kernel(dim_in: int, tk: int):
    needs_mask = (dim_in % tk) != 0   # ragged last feature chunk (trace-time bool)

    def kernel(x_ref, w_ref, b_ref, o_ref, acc_ref):
        """x: (TB,TK) VMEM, w: (1,TK) VMEM, b: (1,) SMEM, o: (1,TB) VMEM,
        acc: (1,TB) f32 VMEM scratch, resident across the feature grid axis."""
        k = pl.program_id(1)

        @pl.when(k == 0)
        def _():
            acc_ref[...] = jnp.zeros_like(acc_ref)

        x = x_ref[...]
        w = w_ref[...]
        if needs_mask:
            # Lanes past dim_in in the last chunk hold garbage from the partial
            # HBM read; zero them in BOTH operands so they cannot pollute the
            # contraction for valid rows (cheap VPU selects on an HBM-bound op).
            lane = lax.broadcasted_iota(jnp.int32, (1, tk), 1) + k * tk
            valid = lane < dim_in
            w = jnp.where(valid, w, 0.0)
            x = jnp.where(valid, x, 0.0)

        # (1, TK) contracted with (TB, TK) over TK -> (1, TB): lane-dense partial
        # product on the MXU (M=1 underutilization is irrelevant: HBM-bound op).
        acc_ref[...] += lax.dot_general(
            w, x,
            dimension_numbers=(((1,), (1,)), ((), ())),
            preferred_element_type=jnp.float32,
        )

        @pl.when(k == pl.num_programs(1) - 1)
        def _():
            z = acc_ref[...] + b_ref[0]   # scalar bias from SMEM (free broadcast)
            # exp goes to the EUP; exact divide kept for tight f32 numerics.
            o_ref[...] = (1.0 / (1.0 + jnp.exp(-z))).astype(o_ref.dtype)

    return kernel


def logistic_regression(x, weight, bias):
    """x: (B, D) f32; weight: (1, D) f32 (PyTorch Linear layout); bias: (1,) f32."""
    B, D = x.shape
    x = x.astype(jnp.float32)
    w = weight.reshape(1, D).astype(jnp.float32)
    b = bias.reshape(1).astype(jnp.float32)

    tb, tk = _choose_tiles(B, D)
    nb = _cdiv(B, tb)
    nk = _cdiv(D, tk)
    b_out = nb * tb   # padded output width (tiny); keeps every output store lane-dense

    out = pl.pallas_call(
        _make_kernel(D, tk),
        out_shape=jax.ShapeDtypeStruct((1, b_out), jnp.float32),
        grid_spec=pltpu.PrefetchScalarGridSpec(
            num_scalar_prefetch=0,
            grid=(nb, nk),
            in_specs=[
                # x streamed unpadded: ragged tail blocks read past the end of x,
                # but that garbage only reaches output columns >= B (sliced off).
                pl.BlockSpec((tb, tk), lambda i, k: (i, k)),
                # weight chunk (resident when nk == 1; its double-buffer bytes are
                # already covered by the budget headroom under the 48 MiB limit).
                pl.BlockSpec((1, tk), lambda i, k: (0, k)),
                # bias scalar lives in SMEM.
                pl.BlockSpec(memory_space=pltpu.MemorySpace.SMEM),
            ],
            out_specs=pl.BlockSpec((1, tb), lambda i, k: (0, i)),
            scratch_shapes=[pltpu.VMEM((1, tb), jnp.float32)],
        ),
        compiler_params=pltpu.CompilerParams(
            # Independent batch tiles -> megacore sharding on v7x (no-op on
            # single-TC v5e/v6e); feature axis is the reduction.
            dimension_semantics=("parallel", "arbitrary"),
            vmem_limit_bytes=_VMEM_LIMIT_BYTES,
        ),
    )(x, w, b)

    return out[0, :B].reshape(B, 1)


if __name__ == "__main__":
    batch, dim_in = 8, 32

    key = jax.random.PRNGKey(0)
    kx, kw, kb = jax.random.split(key, 3)

    x = jax.random.normal(kx, (batch, dim_in), dtype=jnp.float32)
    # Deterministic init mimicking nn.Linear(dim_in, 1): U(-1/sqrt(D), 1/sqrt(D))
    bound = 1.0 / jnp.sqrt(dim_in)
    weight = jax.random.uniform(kw, (1, dim_in), minval=-bound, maxval=bound,
                                dtype=jnp.float32)
    bias = jax.random.uniform(kb, (1,), minval=-bound, maxval=bound,
                              dtype=jnp.float32)

    out = logistic_regression(x, weight, bias)
    jax.block_until_ready(out)

    # Pure-JAX reference check
    ref = jax.nn.sigmoid(x @ weight.T + bias)
    assert out.shape == (batch, 1)
    assert jnp.allclose(out, ref, atol=1e-5), "mismatch vs reference"

    print("KERNEL_OK")
</pallas_src>

<mosaic_0001>
module attributes {stable_mosaic.version = 11 : i64} {
  func.func @kernel(%arg0: i32, %arg1: i32, %arg2: memref<8x32xf32, #tpu.memory_space<vmem>>, %arg3: memref<1x32xf32, #tpu.memory_space<vmem>>, %arg4: memref<1xf32, #tpu.memory_space<smem>>, %arg5: memref<1x8xf32, #tpu.memory_space<vmem>>, %arg6: memref<1x8xf32, #tpu.memory_space<vmem>>) attributes {dimension_semantics = [#tpu.dimension_semantics<parallel>, #tpu.dimension_semantics<arbitrary>], iteration_bounds = array<i64: 1, 1>, scalar_prefetch = 0 : i64, scratch_operands = 1 : i64, tpu.core_type = #tpu.core_type<tc>, window_params = [{transform_indices = @transform_0, window_bounds = array<i64: 8, 32>}, {transform_indices = @transform_1, window_bounds = array<i64: 1, 32>}, {transform_indices = @transform_2, window_bounds = array<i64: 1>}, {transform_indices = @transform_3, window_bounds = array<i64: 1, 8>}]} {
    %c0_i32 = arith.constant 0 : i32
    %0 = arith.cmpi eq, %arg1, %c0_i32 : i32
    %1 = arith.extui %0 : i1 to i32
    %c0_i32_0 = arith.constant 0 : i32
    %2 = arith.cmpi ne, %1, %c0_i32_0 : i32
    scf.if %2 {
      %cst_10 = arith.constant 0.000000e+00 : f32
      %12 = vector.broadcast %cst_10 : f32 to vector<1x8xf32>
      %c0_11 = arith.constant 0 : index
      %c0_12 = arith.constant 0 : index
      %13 = vector.load %arg6[%c0_11, %c0_12] : memref<1x8xf32, #tpu.memory_space<vmem>>, vector<1x8xf32>
      tpu.vector_store %arg6[%c0_11, %c0_12], %12 {strides = array<i32>} : memref<1x8xf32, #tpu.memory_space<vmem>>, vector<1x8xf32>,
    } else {
    }
    %c0 = arith.constant 0 : index
    %c0_1 = arith.constant 0 : index
    %3 = vector.load %arg2[%c0, %c0_1] : memref<8x32xf32, #tpu.memory_space<vmem>>, vector<8x32xf32>
    %c0_2 = arith.constant 0 : index
    %c0_3 = arith.constant 0 : index
    %4 = vector.load %arg3[%c0_2, %c0_3] : memref<1x32xf32, #tpu.memory_space<vmem>>, vector<1x32xf32>
    %c0_4 = arith.constant 0 : index
    %c0_5 = arith.constant 0 : index
    %5 = vector.load %arg6[%c0_4, %c0_5] : memref<1x8xf32, #tpu.memory_space<vmem>>, vector<1x8xf32>
    %cst = arith.constant dense<0.000000e+00> : vector<1x8xf32>
    %6 = tpu.matmul %4, %3, %cst {dimension_numbers = #tpu.dot_dimension_numbers<[1], [1], [0], [0], [0, 0, 1, 0], [], []>} : vector<1x32xf32>, vector<8x32xf32>, vector<1x8xf32> -> vector<1x8xf32>
    %7 = arith.addf %5, %6 : vector<1x8xf32>
    %c0_6 = arith.constant 0 : index
    %c0_7 = arith.constant 0 : index
    %8 = vector.load %arg6[%c0_6, %c0_7] : memref<1x8xf32, #tpu.memory_space<vmem>>, vector<1x8xf32>
    tpu.vector_store %arg6[%c0_6, %c0_7], %7 {strides = array<i32>} : memref<1x8xf32, #tpu.memory_space<vmem>>, vector<1x8xf32>,
    %c0_i32_8 = arith.constant 0 : i32
    %9 = arith.cmpi eq, %arg1, %c0_i32_8 : i32
    %10 = arith.extui %9 : i1 to i32
    %c0_i32_9 = arith.constant 0 : i32
    %11 = arith.cmpi ne, %10, %c0_i32_9 : i32
    scf.if %11 {
      %c0_10 = arith.constant 0 : index
      %c0_11 = arith.constant 0 : index
      %12 = vector.load %arg6[%c0_10, %c0_11] : memref<1x8xf32, #tpu.memory_space<vmem>>, vector<1x8xf32>
      %c0_12 = arith.constant 0 : index
      %13 = memref.load %arg4[%c0_12] : memref<1xf32, #tpu.memory_space<smem>>
      %14 = vector.broadcast %13 : f32 to vector<1x8xf32>
      %15 = arith.addf %12, %14 : vector<1x8xf32>
      %cst_13 = arith.constant 0.000000e+00 : f32
      %16 = vector.broadcast %cst_13 : f32 to vector<1x8xf32>
      %17 = arith.subf %16, %15 : vector<1x8xf32>
      %18 = math.exp %17 : vector<1x8xf32>
      %cst_14 = arith.constant 1.000000e+00 : f32
      %19 = vector.broadcast %cst_14 : f32 to vector<1x8xf32>
      %20 = arith.addf %19, %18 : vector<1x8xf32>
      %cst_15 = arith.constant 1.000000e+00 : f32
      %21 = vector.broadcast %cst_15 : f32 to vector<1x8xf32>
      %22 = arith.divf %21, %20 : vector<1x8xf32>
      %c0_16 = arith.constant 0 : index
      %c0_17 = arith.constant 0 : index
      %23 = vector.load %arg5[%c0_16, %c0_17] : memref<1x8xf32, #tpu.memory_space<vmem>>, vector<1x8xf32>
      tpu.vector_store %arg5[%c0_16, %c0_17], %22 {strides = array<i32>} : memref<1x8xf32, #tpu.memory_space<vmem>>, vector<1x8xf32>,
    } else {
    }
    return
  }
  func.func @transform_0(%arg0: i32, %arg1: i32) -> (i32, i32) {
    %c0_i32 = arith.constant 0 : i32
    return %arg0, %arg1 : i32, i32
  }
  func.func @transform_1(%arg0: i32, %arg1: i32) -> (i32, i32) {
    %c0_i32 = arith.constant 0 : i32
    %c0_i32_0 = arith.constant 0 : i32
    return %c0_i32, %arg1 : i32, i32
  }
  func.func @transform_2(%arg0: i32, %arg1: i32) -> i32 {
    %c0_i32 = arith.constant 0 : i32
    %c0_i32_0 = arith.constant 0 : i32
    return %c0_i32 : i32
  }
  func.func @transform_3(%arg0: i32, %arg1: i32) -> (i32, i32) {
    %c0_i32 = arith.constant 0 : i32
    %c0_i32_0 = arith.constant 0 : i32
    return %c0_i32, %arg0 : i32, i32
  }
}

</mosaic_0001>

<bundles_post_ra>
// kernel: tpu_custom_call.1
= control target key start
LH: loop header
LB: loop body
LE: loop exit
PB: predicated region body
PF: predicated region fallthrough
CT: control target
= control target key end

     0   :  { %9 = vsyncpa [#allocation5], 0  ;;  %s268_s0 = inlined_call_operand.hbm [shape: f32[8,32], index: 0, kind: input, shape index: {}]   ;;  %s269_s1 = inlined_call_operand.vmem [shape: f32[1,32], index: 1, kind: input, shape index: {}]   ;;  %s270_s2 = inlined_call_operand.<no memory space> [shape: f32[1], index: 2, kind: input, shape index: {}]   ;;  %s271_s3 = inlined_call_operand.hbm [shape: f32[1,8], index: 3, kind: output, shape index: {}]  }
   0x1   :  { %10 = vsyncpa [#allocation6], 0  ;;  %s211_s12 = smov [#allocation4]   ;;  %s163_s16 = scalar_lea.hbm %s268_s0, 128 }
   0x2   :  { %s17_s13 = sshll.u32 %s211_s12, 4  ;;  %p164_p0 = scmp.ne.s32.totalorder %s268_s0, %s163_s16  ;;  %s18_s13 = int_to_ptr.vmem [resolvable:$true] %s17_s13 }
   0x3   :  { %p167_p1 = scmp.lt.u32.totalorder %s163_s16, %s268_s0 }
   0x5   :  { %p169_p2 = pnand %p167_p1, %p164_p0 }
   0x7   :  { %172 = shalt.err (!%p169_p2)
}
   0x8   :  { %s173_s21 = scalar_lea.vmem %s18_s13, 128  ;;  %p178_p4 = scmp.lt.s32.totalorder %s18_s13, %s18_s13 }
   0x9   :  { %p174_p3 = scmp.ne.s32.totalorder %s18_s13, %s173_s21  ;;  %p179_p5 = scmp.lt.s32.totalorder %s173_s21, %s173_s21 }
   0xb   :  { %p180_p6 = por %p179_p5, %p178_p4 }
   0xd   :  { %p181_p7 = pnand %p180_p6, %p174_p3 }
   0xf   :  { %184 = shalt.err (!%p181_p7)
}
  0x10   :  { %20 = dma.hbm_to_vmem [thread:$0]  %s268_s0, 128, %s18_s13, [#allocation5]  }
  0x11   :  { %207 = dma.done.wait [#allocation5], 128  }
  0x12   :  { %208 = vsyncadd [#allocation5], 4294967168  ;;  %vm32_vm0 = vcmask 57344   ;;  %v212_v0 = vmov 0.0   ;;  %vm213_vm1 = vmmov 0   ;;  %vm37_vm2 = vcmask 261120  }
  0x13   :  { %33 = vst.msk [vmem:[#allocation2] sm:$0x1] %vm32_vm0, %v212_v0  ;;  %150 = vmatprep.subr.mxu0 %v212_v0  ;;  %152 = vmatprep.mubr.msk.f32.mxu0 %vm213_vm1, %v212_v0  ;;  %v34_v1 = vld [vmem:[#allocation4] sm:$0xff]  ;;  %v35_v2 = vld [vmem:[%s269_s1] sm:$0x1]  ;;  %v122_v7 = vstv %s270_s2  ;;  %s214_s1 = smov [#allocation7]  }
  0x14   :  { %151 = vmatpush3.xpose.msk.msra.mxu0 %vm37_vm2, %v34_v1  ;;  %s137_s27 = sshll.u32 %s214_s1, 4  ;;  %s138_s27 = int_to_ptr.vmem [resolvable:$true] %s137_s27 }
  0x15   :  { %s185_s28 = scalar_lea.vmem %s138_s27, 16  ;;  %s189_s29 = scalar_lea.vmem %s138_s27, 32 }
  0x16   :  { %p186_p8 = scmp.ne.s32.totalorder %s138_s27, %s185_s28  ;;  %p190_p9 = scmp.lt.s32.totalorder %s138_s27, %s138_s27 }
  0x17   :  { %153 = vmatmul.mubr.msk.f32.vlgmr.msra.gmra.mrb[0].mxu0 %vm37_vm2, %v35_v2  ;;  %p191_p10 = scmp.lt.s32.totalorder %s189_s29, %s185_s28 }
  0x19   :  { %p192_p11 = por %p191_p10, %p190_p9 }
  0x1a   :  { %v36_v3 = vld [vmem:[#allocation2] sm:$0x1] }
  0x1b   :  { %p193_p12 = pnand %p192_p11, %p186_p8 }
  0xea   :  { %v110_v4 = vpop.f32.mrb[0].mxu0 }
  0xeb   :  { %v114_v5 = vadd.f32 %v110_v4, %v36_v3  ;;  %v154_v6 = vpop.f32.mrb[1].mxu0 }
  0xed   :  { %116 = vst.msk [vmem:[#allocation2] sm:$0x1] %vm32_vm0, %v114_v5 }
  0xf4   :  { %v120_v8 = vld [vmem:[#allocation2] sm:$0x1] }
  0xf5   :  { %v123_v9 = vadd.f32 %v122_v7, %v120_v8 }
  0xf7   :  { %v124_v10 = vsub.f32 0.0, %v123_v9 }
  0xf9   :  { %v125_v11 = vmul.f32 1.442695, %v124_v10 }
  0xfb   :  { %159 = vpow2.f32 %v125_v11 }
 0x105   :  { %v160_v12 = vpop.eup %159 }
 0x106   :  { %v127_v13 = vadd.f32 1.0, %v160_v12 }
 0x108   :  { %161 = vrcp.f32 %v127_v13 }
 0x112   :  { %v162_v14 = vpop.eup %161 }
 0x113   :  { %130 = vst.msk [vmem:[#allocation7] sm:$0x1] %vm32_vm0, %v162_v14 }
 0x114   :  { %196 = shalt.err (!%p193_p12)
}
 0x115   :  { %s197_s4 = scalar_lea.hbm %s271_s3, 16 }
 0x116   :  { %p198_p13 = scmp.ne.s32.totalorder %s271_s3, %s197_s4  ;;  %p201_p0 = scmp.lt.u32.totalorder %s197_s4, %s271_s3 }
 0x118   :  { %p203_p1 = pnand %p201_p0, %p198_p13 }
 0x11a   :  { %206 = shalt.err (!%p203_p1)
}
 0x11b   :  { %140 = dma.vmem_to_hbm [thread:$0]  %s138_s27, 16, %s271_s3, [#allocation6]  }
 0x11c   :  { %209 = dma.done.wait [#allocation6], 16  }
 0x11d   :  { %210 = vsyncadd [#allocation6], 4294967280 }
 0x11e   :  { %144 = vsyncpa [#allocation5], 1 }
 0x11f   :  { %145 = vsyncpa [#allocation6], 1 }

</bundles_post_ra>
